<compile_context>
chip_gen: v5e
topology: v5e:2x2
jax: 0.10.0
libtpu: 0.0.40
codegen_flags: <defaults>
</compile_context>

<pallas_src>
import functools

import jax
import jax.numpy as jnp
from jax.experimental import pallas as pl
from jax.experimental.pallas import tpu as pltpu


def _edge_aware_kernel(pred_ref, target_ref, out_ref, *, eps):
    """One grid step: a (bb, C, H, W) batch-block of pred/target.

    Writes the packed partial sums (num_dx, den_dx, num_dy, den_dy) to a
    lane-dense (1, 128) output row.  Division happens in the wrapper on the
    globally accumulated sums.
    """
    bb, C, H, W = pred_ref.shape

    shift_x = W - 1  # roll by -1 (mod W) along lanes
    shift_y = H - 1  # roll by -1 (mod H) along sublanes

    # Convention-agnostic wrap masks: a position is a valid finite-difference
    # pair iff its rolled neighbour index differs by exactly 1.  This zeroes
    # the wrap column/row regardless of pltpu.roll's direction convention and
    # degenerates to all-zero for W == 1 / H == 1.  Computed once per grid
    # step -> negligible vs the bb*C channel loop.
    lane = jax.lax.broadcasted_iota(jnp.int32, (H, W), 1)
    dx_valid = (jnp.abs(pltpu.roll(lane, shift_x, axis=1) - lane) == 1
                ).astype(jnp.float32)
    subl = jax.lax.broadcasted_iota(jnp.int32, (H, W), 0)
    dy_valid = (jnp.abs(pltpu.roll(subl, shift_y, axis=0) - subl) == 1
                ).astype(jnp.float32)

    # Bounded unroll for the channel loop (keeps live ranges bounded).
    if C <= 8:
        unroll = True
    else:
        unroll = max(u for u in (8, 4, 2, 1) if C % u == 0)

    num_dx = jnp.float32(0.0)
    den_dx = jnp.float32(0.0)
    num_dy = jnp.float32(0.0)
    den_dy = jnp.float32(0.0)

    for b in range(bb):  # static, small (bb capped in the wrapper)
        # valid_mask = (target[:, 0] > eps) for this batch element.
        mask = (target_ref[b, 0] > eps).astype(jnp.float32)         # (H, W)
        mdx = mask * pltpu.roll(mask, shift_x, axis=1) * dx_valid   # (H, W)
        mdy = mask * pltpu.roll(mask, shift_y, axis=0) * dy_valid   # (H, W)

        def body(c, carry, b=b):
            ldx, ldy = carry
            # Shared pred-target difference: (roll(p)-p)-(roll(t)-t)
            # == roll(d)-d.  Subtract in native dtype, upcast once.
            d = (pred_ref[b, c] - target_ref[b, c]).astype(jnp.float32)
            ddx = pltpu.roll(d, shift_x, axis=1) - d
            ddy = pltpu.roll(d, shift_y, axis=0) - d
            return ldx + ddx * ddx, ldy + ddy * ddy

        ldx, ldy = jax.lax.fori_loop(
            0, C, body,
            (jnp.zeros((H, W), jnp.float32), jnp.zeros((H, W), jnp.float32)),
            unroll=unroll)

        # Sum over C happened above; one mask multiply per direction.
        num_dx += jnp.sum(ldx * mdx)
        den_dx += jnp.sum(mdx)
        num_dy += jnp.sum(ldy * mdy)
        den_dy += jnp.sum(mdy)

    # Pack the four partial sums lane-dense into one (1, 128) output row.
    lane_o = jax.lax.broadcasted_iota(jnp.int32, (1, 128), 1)
    vals = jnp.where(lane_o == 0, num_dx,
           jnp.where(lane_o == 1, den_dx,
           jnp.where(lane_o == 2, num_dy,
           jnp.where(lane_o == 3, den_dy, 0.0))))
    out_ref[0] = vals


def _vmem_cap_bytes():
    """~62% of physical VMEM (headroom for output buffers / Mosaic scratch):
    ~40 MiB on v7x (64 MiB per TC), ~80 MiB on v5e/v6e (128 MiB).
    Conservative 40 MiB fallback if the query is unavailable."""
    try:
        phys = getattr(pltpu.get_tpu_info(), "vmem_capacity_bytes", None)
        if phys:
            return int(phys) * 5 // 8
    except Exception:
        pass
    return 40 << 20


def _choose_bb(batch, elem_bytes, budget_bytes, max_bb=16):
    """Largest divisor of `batch` (capped) whose per-step input bytes fit the
    budget while keeping >= 2 grid steps (v7x megacore balance)."""
    if batch <= 1:
        return 1
    best = 1
    for bb in range(1, min(batch // 2, max_bb) + 1):
        if batch % bb == 0 and bb * elem_bytes <= budget_bytes:
            best = bb
    return best


def edge_aware_loss(pred, target, *, eps=-100.0, loss_weight=1.0,
                    reduction='mean'):
    """JAX/Pallas equivalent of EdgeAwareLoss.forward (valid_mask=None,
    weight=None, avg_factor=None, reduction_override=None)."""
    assert pred.shape == target.shape, (
        f'The shapes of pred ({pred.shape}) and target ({target.shape}) '
        f'are mismatched')
    assert reduction in ('mean', 'sum'), 'Only mean/sum supported here'
    # TODO(synk): reduction='none' expands the scalar loss to pred.shape[0];
    # not implemented since the kernel produces a scalar loss.

    B, C, H, W = pred.shape
    itemsize = jnp.dtype(pred.dtype).itemsize
    elem_bytes = C * H * W * itemsize          # one batch element, one input

    cap = _vmem_cap_bytes()
    temp_bytes = 14 * H * W * 4                # live (H, W) f32 temporaries
    # Per-step input budget: 2 inputs x 2 pipeline buffers -> /4; aim for
    # ~1-4 MiB contiguous DMAs (HBM-bound kernel; big tiles are the lever).
    per_step_budget = min(4 << 20, max(1, (cap - temp_bytes - (4 << 20)) // 4))
    bb = _choose_bb(B, elem_bytes, per_step_budget)
    nsteps = B // bb

    needed = 4 * bb * elem_bytes + temp_bytes + (2 << 20)
    vmem_bytes = max(needed, 16 << 20)
    if vmem_bytes > cap:
        # A single batch element (plus temporaries) exceeds the conservative
        # cap; request what we need anyway (fits v5e/v6e's 128 MiB VMEM).
        # TODO(synk): add an H grid axis with a 1-row halo so one tile never
        # exceeds ~40 MiB on v7x (64 MiB physical VMEM per TensorCore).
        vmem_bytes = min(vmem_bytes, 100 << 20)
    vmem_bytes = int(vmem_bytes)

    # TODO(synk): for narrow W (< 128 lanes) pre-pack rows into the lane axis
    # (or pad W to 128 with below-eps target values) for full vector
    # utilization; skipped here to keep the NCHW layout untouched.

    kernel = functools.partial(_edge_aware_kernel, eps=float(eps))
    partials = pl.pallas_call(
        kernel,
        out_shape=jax.ShapeDtypeStruct((nsteps, 1, 128), jnp.float32),
        grid_spec=pltpu.PrefetchScalarGridSpec(
            num_scalar_prefetch=0,
            grid=(nsteps,),
            in_specs=[
                pl.BlockSpec((bb, C, H, W), lambda i: (i, 0, 0, 0)),
                pl.BlockSpec((bb, C, H, W), lambda i: (i, 0, 0, 0)),
            ],
            out_specs=pl.BlockSpec((1, 1, 128), lambda i: (i, 0, 0)),
        ),
        compiler_params=pltpu.CompilerParams(
            dimension_semantics=("parallel",),
            vmem_limit_bytes=vmem_bytes,
        ),
    )(pred, target)

    # Global accumulation across grid steps, then the clamped divisions
    # (done once, never per tile).
    sums = jnp.sum(partials[:, 0, :], axis=0)          # (128,) f32
    num_dx, den_dx, num_dy, den_dy = sums[0], sums[1], sums[2], sums[3]
    loss = (num_dx / jnp.maximum(den_dx, 1.0)
            + num_dy / jnp.maximum(den_dy, 1.0))

    # weight_reduce_loss with weight=None, avg_factor=None: 'mean'/'sum' of a
    # scalar are identities; the module pre-multiplies by batch for 'sum'.
    if reduction == 'sum':
        loss = loss * B
    loss = loss * loss_weight
    loss = jnp.nan_to_num(loss, nan=0.0, posinf=0.0, neginf=0.0)
    return loss.astype(pred.dtype)


def _edge_aware_loss_ref(pred, target, *, eps=-100.0, loss_weight=1.0):
    # Pure-JAX reference for verification.
    p = pred.astype(jnp.float32)
    t = target.astype(jnp.float32)
    mask = (t[:, 0:1, :, :] > eps).astype(jnp.float32)
    pdx = p[:, :, :, 1:] - p[:, :, :, :-1]
    tdx = t[:, :, :, 1:] - t[:, :, :, :-1]
    mdx = mask[:, :, :, 1:] * mask[:, :, :, :-1]
    pdy = p[:, :, 1:, :] - p[:, :, :-1, :]
    tdy = t[:, :, 1:, :] - t[:, :, :-1, :]
    mdy = mask[:, :, 1:, :] * mask[:, :, :-1, :]
    ldx = ((pdx - tdx) ** 2 * mdx).sum() / jnp.maximum(mdx.sum(), 1.0)
    ldy = ((pdy - tdy) ** 2 * mdy).sum() / jnp.maximum(mdy.sum(), 1.0)
    loss = (ldx + ldy) * loss_weight
    return jnp.nan_to_num(loss, nan=0.0, posinf=0.0, neginf=0.0)


if __name__ == "__main__":
    key = jax.random.PRNGKey(0)
    k1, k2 = jax.random.split(key)
    B, C, H, W = 2, 4, 16, 16
    pred = jax.random.normal(k1, (B, C, H, W), dtype=jnp.float32)
    target = jax.random.normal(k2, (B, C, H, W), dtype=jnp.float32)
    # Invalidate a patch (target channel 0 below eps) so masking is exercised.
    target = target.at[:, 0, 4:8, 4:8].set(-200.0)

    loss = edge_aware_loss(pred, target, eps=-100.0, loss_weight=1.0,
                           reduction='mean')
    loss = jax.block_until_ready(loss)

    ref = _edge_aware_loss_ref(pred, target, eps=-100.0, loss_weight=1.0)
    assert jnp.allclose(loss, ref, rtol=1e-4, atol=1e-5), (loss, ref)

    print("KERNEL_OK")
</pallas_src>

<mosaic_0001>
module attributes {stable_mosaic.version = 11 : i64} {
  func.func @_edge_aware_kernel(%arg0: i32, %arg1: memref<1x4x16x16xf32, #tpu.memory_space<vmem>>, %arg2: memref<1x4x16x16xf32, #tpu.memory_space<vmem>>, %arg3: memref<1x1x128xf32, #tpu.memory_space<vmem>>) attributes {dimension_semantics = [#tpu.dimension_semantics<parallel>], iteration_bounds = array<i64: 2>, scalar_prefetch = 0 : i64, scratch_operands = 0 : i64, tpu.core_type = #tpu.core_type<tc>, window_params = [{transform_indices = @transform_0, window_bounds = array<i64: 1, 4, 16, 16>}, {transform_indices = @transform_1, window_bounds = array<i64: 1, 4, 16, 16>}, {transform_indices = @transform_2, window_bounds = array<i64: 1, 1, 128>}]} {
    %0 = tpu.iota {dimensions = array<i32: 1>} : vector<16x16xi32>
    %c15_i32 = arith.constant 15 : i32
    %1 = tpu.dynamic_rotate %0 by %c15_i32 dim 1 : vector<16x16xi32>, i32 -> vector<16x16xi32>
    %2 = arith.subi %1, %0 : vector<16x16xi32>
    %3 = math.absi %2 : vector<16x16xi32>
    %c1_i32 = arith.constant 1 : i32
    %4 = vector.broadcast %c1_i32 : i32 to vector<16x16xi32>
    %5 = arith.cmpi eq, %3, %4 : vector<16x16xi32>
    %6 = arith.extui %5 : vector<16x16xi1> to vector<16x16xi32>
    %7 = arith.sitofp %6 : vector<16x16xi32> to vector<16x16xf32>
    %8 = tpu.iota {dimensions = array<i32: 0>} : vector<16x16xi32>
    %c15_i32_0 = arith.constant 15 : i32
    %9 = tpu.dynamic_rotate %8 by %c15_i32_0 dim 0 : vector<16x16xi32>, i32 -> vector<16x16xi32>
    %10 = arith.subi %9, %8 : vector<16x16xi32>
    %11 = math.absi %10 : vector<16x16xi32>
    %c1_i32_1 = arith.constant 1 : i32
    %12 = vector.broadcast %c1_i32_1 : i32 to vector<16x16xi32>
    %13 = arith.cmpi eq, %11, %12 : vector<16x16xi32>
    %14 = arith.extui %13 : vector<16x16xi1> to vector<16x16xi32>
    %15 = arith.sitofp %14 : vector<16x16xi32> to vector<16x16xf32>
    %c0 = arith.constant 0 : index
    %c0_2 = arith.constant 0 : index
    %c0_3 = arith.constant 0 : index
    %c0_4 = arith.constant 0 : index
    %16 = vector.load %arg2[%c0, %c0_2, %c0_3, %c0_4] : memref<1x4x16x16xf32, #tpu.memory_space<vmem>>, vector<1x1x16x16xf32>
    %17 = vector.shape_cast %16 : vector<1x1x16x16xf32> to vector<16x16xf32>
    %cst = arith.constant -1.000000e+02 : f32
    %18 = vector.broadcast %cst : f32 to vector<16x16xf32>
    %19 = arith.cmpf ogt, %17, %18 : vector<16x16xf32>
    %20 = arith.extui %19 : vector<16x16xi1> to vector<16x16xi32>
    %21 = arith.sitofp %20 : vector<16x16xi32> to vector<16x16xf32>
    %c15_i32_5 = arith.constant 15 : i32
    %22 = tpu.dynamic_rotate %21 by %c15_i32_5 dim 1 : vector<16x16xf32>, i32 -> vector<16x16xf32>
    %23 = arith.mulf %21, %22 : vector<16x16xf32>
    %24 = arith.mulf %23, %7 : vector<16x16xf32>
    %c15_i32_6 = arith.constant 15 : i32
    %25 = tpu.dynamic_rotate %21 by %c15_i32_6 dim 0 : vector<16x16xf32>, i32 -> vector<16x16xf32>
    %26 = arith.mulf %21, %25 : vector<16x16xf32>
    %27 = arith.mulf %26, %15 : vector<16x16xf32>
    %cst_7 = arith.constant 0.000000e+00 : f32
    %28 = vector.broadcast %cst_7 : f32 to vector<16x16xf32>
    %cst_8 = arith.constant 0.000000e+00 : f32
    %29 = vector.broadcast %cst_8 : f32 to vector<16x16xf32>
    %c0_i32 = arith.constant 0 : i32
    %c0_9 = arith.constant 0 : index
    %30 = arith.index_cast %c0_i32 : i32 to index
    %c0_10 = arith.constant 0 : index
    %c0_11 = arith.constant 0 : index
    %31 = vector.load %arg1[%c0_9, %30, %c0_10, %c0_11] : memref<1x4x16x16xf32, #tpu.memory_space<vmem>>, vector<1x1x16x16xf32>
    %32 = vector.shape_cast %31 : vector<1x1x16x16xf32> to vector<16x16xf32>
    %c0_12 = arith.constant 0 : index
    %33 = arith.index_cast %c0_i32 : i32 to index
    %c0_13 = arith.constant 0 : index
    %c0_14 = arith.constant 0 : index
    %34 = vector.load %arg2[%c0_12, %33, %c0_13, %c0_14] : memref<1x4x16x16xf32, #tpu.memory_space<vmem>>, vector<1x1x16x16xf32>
    %35 = vector.shape_cast %34 : vector<1x1x16x16xf32> to vector<16x16xf32>
    %36 = arith.subf %32, %35 : vector<16x16xf32>
    %c15_i32_15 = arith.constant 15 : i32
    %37 = tpu.dynamic_rotate %36 by %c15_i32_15 dim 1 : vector<16x16xf32>, i32 -> vector<16x16xf32>
    %38 = arith.subf %37, %36 : vector<16x16xf32>
    %c15_i32_16 = arith.constant 15 : i32
    %39 = tpu.dynamic_rotate %36 by %c15_i32_16 dim 0 : vector<16x16xf32>, i32 -> vector<16x16xf32>
    %40 = arith.subf %39, %36 : vector<16x16xf32>
    %41 = arith.mulf %38, %38 : vector<16x16xf32>
    %42 = arith.addf %28, %41 : vector<16x16xf32>
    %43 = arith.mulf %40, %40 : vector<16x16xf32>
    %44 = arith.addf %29, %43 : vector<16x16xf32>
    %c1_i32_17 = arith.constant 1 : i32
    %c0_18 = arith.constant 0 : index
    %45 = arith.index_cast %c1_i32_17 : i32 to index
    %c0_19 = arith.constant 0 : index
    %c0_20 = arith.constant 0 : index
    %46 = vector.load %arg1[%c0_18, %45, %c0_19, %c0_20] : memref<1x4x16x16xf32, #tpu.memory_space<vmem>>, vector<1x1x16x16xf32>
    %47 = vector.shape_cast %46 : vector<1x1x16x16xf32> to vector<16x16xf32>
    %c0_21 = arith.constant 0 : index
    %48 = arith.index_cast %c1_i32_17 : i32 to index
    %c0_22 = arith.constant 0 : index
    %c0_23 = arith.constant 0 : index
    %49 = vector.load %arg2[%c0_21, %48, %c0_22, %c0_23] : memref<1x4x16x16xf32, #tpu.memory_space<vmem>>, vector<1x1x16x16xf32>
    %50 = vector.shape_cast %49 : vector<1x1x16x16xf32> to vector<16x16xf32>
    %51 = arith.subf %47, %50 : vector<16x16xf32>
    %c15_i32_24 = arith.constant 15 : i32
    %52 = tpu.dynamic_rotate %51 by %c15_i32_24 dim 1 : vector<16x16xf32>, i32 -> vector<16x16xf32>
    %53 = arith.subf %52, %51 : vector<16x16xf32>
    %c15_i32_25 = arith.constant 15 : i32
    %54 = tpu.dynamic_rotate %51 by %c15_i32_25 dim 0 : vector<16x16xf32>, i32 -> vector<16x16xf32>
    %55 = arith.subf %54, %51 : vector<16x16xf32>
    %56 = arith.mulf %53, %53 : vector<16x16xf32>
    %57 = arith.addf %42, %56 : vector<16x16xf32>
    %58 = arith.mulf %55, %55 : vector<16x16xf32>
    %59 = arith.addf %44, %58 : vector<16x16xf32>
    %c2_i32 = arith.constant 2 : i32
    %c0_26 = arith.constant 0 : index
    %60 = arith.index_cast %c2_i32 : i32 to index
    %c0_27 = arith.constant 0 : index
    %c0_28 = arith.constant 0 : index
    %61 = vector.load %arg1[%c0_26, %60, %c0_27, %c0_28] : memref<1x4x16x16xf32, #tpu.memory_space<vmem>>, vector<1x1x16x16xf32>
    %62 = vector.shape_cast %61 : vector<1x1x16x16xf32> to vector<16x16xf32>
    %c0_29 = arith.constant 0 : index
    %63 = arith.index_cast %c2_i32 : i32 to index
    %c0_30 = arith.constant 0 : index
    %c0_31 = arith.constant 0 : index
    %64 = vector.load %arg2[%c0_29, %63, %c0_30, %c0_31] : memref<1x4x16x16xf32, #tpu.memory_space<vmem>>, vector<1x1x16x16xf32>
    %65 = vector.shape_cast %64 : vector<1x1x16x16xf32> to vector<16x16xf32>
    %66 = arith.subf %62, %65 : vector<16x16xf32>
    %c15_i32_32 = arith.constant 15 : i32
    %67 = tpu.dynamic_rotate %66 by %c15_i32_32 dim 1 : vector<16x16xf32>, i32 -> vector<16x16xf32>
    %68 = arith.subf %67, %66 : vector<16x16xf32>
    %c15_i32_33 = arith.constant 15 : i32
    %69 = tpu.dynamic_rotate %66 by %c15_i32_33 dim 0 : vector<16x16xf32>, i32 -> vector<16x16xf32>
    %70 = arith.subf %69, %66 : vector<16x16xf32>
    %71 = arith.mulf %68, %68 : vector<16x16xf32>
    %72 = arith.addf %57, %71 : vector<16x16xf32>
    %73 = arith.mulf %70, %70 : vector<16x16xf32>
    %74 = arith.addf %59, %73 : vector<16x16xf32>
    %c3_i32 = arith.constant 3 : i32
    %c0_34 = arith.constant 0 : index
    %75 = arith.index_cast %c3_i32 : i32 to index
    %c0_35 = arith.constant 0 : index
    %c0_36 = arith.constant 0 : index
    %76 = vector.load %arg1[%c0_34, %75, %c0_35, %c0_36] : memref<1x4x16x16xf32, #tpu.memory_space<vmem>>, vector<1x1x16x16xf32>
    %77 = vector.shape_cast %76 : vector<1x1x16x16xf32> to vector<16x16xf32>
    %c0_37 = arith.constant 0 : index
    %78 = arith.index_cast %c3_i32 : i32 to index
    %c0_38 = arith.constant 0 : index
    %c0_39 = arith.constant 0 : index
    %79 = vector.load %arg2[%c0_37, %78, %c0_38, %c0_39] : memref<1x4x16x16xf32, #tpu.memory_space<vmem>>, vector<1x1x16x16xf32>
    %80 = vector.shape_cast %79 : vector<1x1x16x16xf32> to vector<16x16xf32>
    %81 = arith.subf %77, %80 : vector<16x16xf32>
    %c15_i32_40 = arith.constant 15 : i32
    %82 = tpu.dynamic_rotate %81 by %c15_i32_40 dim 1 : vector<16x16xf32>, i32 -> vector<16x16xf32>
    %83 = arith.subf %82, %81 : vector<16x16xf32>
    %c15_i32_41 = arith.constant 15 : i32
    %84 = tpu.dynamic_rotate %81 by %c15_i32_41 dim 0 : vector<16x16xf32>, i32 -> vector<16x16xf32>
    %85 = arith.subf %84, %81 : vector<16x16xf32>
    %86 = arith.mulf %83, %83 : vector<16x16xf32>
    %87 = arith.addf %72, %86 : vector<16x16xf32>
    %88 = arith.mulf %85, %85 : vector<16x16xf32>
    %89 = arith.addf %74, %88 : vector<16x16xf32>
    %c4_i32 = arith.constant 4 : i32
    %90 = arith.mulf %87, %24 : vector<16x16xf32>
    %91 = vector.shape_cast %90 : vector<16x16xf32> to vector<1x16x16xf32>
    %cst_42 = arith.constant dense<0.000000e+00> : vector<1xf32>
    %92 = vector.multi_reduction <add>, %91, %cst_42 [1, 2] : vector<1x16x16xf32> to vector<1xf32>
    %93 = vector.shape_cast %92 : vector<1xf32> to vector<1x1x1xf32>
    %94 = vector.extract %93[0, 0, 0] : f32 from vector<1x1x1xf32>
    %cst_43 = arith.constant 0.000000e+00 : f32
    %95 = arith.addf %cst_43, %94 : f32
    %96 = vector.shape_cast %24 : vector<16x16xf32> to vector<1x16x16xf32>
    %cst_44 = arith.constant dense<0.000000e+00> : vector<1xf32>
    %97 = vector.multi_reduction <add>, %96, %cst_44 [1, 2] : vector<1x16x16xf32> to vector<1xf32>
    %98 = vector.shape_cast %97 : vector<1xf32> to vector<1x1x1xf32>
    %99 = vector.extract %98[0, 0, 0] : f32 from vector<1x1x1xf32>
    %cst_45 = arith.constant 0.000000e+00 : f32
    %100 = arith.addf %cst_45, %99 : f32
    %101 = arith.mulf %89, %27 : vector<16x16xf32>
    %102 = vector.shape_cast %101 : vector<16x16xf32> to vector<1x16x16xf32>
    %cst_46 = arith.constant dense<0.000000e+00> : vector<1xf32>
    %103 = vector.multi_reduction <add>, %102, %cst_46 [1, 2] : vector<1x16x16xf32> to vector<1xf32>
    %104 = vector.shape_cast %103 : vector<1xf32> to vector<1x1x1xf32>
    %105 = vector.extract %104[0, 0, 0] : f32 from vector<1x1x1xf32>
    %cst_47 = arith.constant 0.000000e+00 : f32
    %106 = arith.addf %cst_47, %105 : f32
    %107 = vector.shape_cast %27 : vector<16x16xf32> to vector<1x16x16xf32>
    %cst_48 = arith.constant dense<0.000000e+00> : vector<1xf32>
    %108 = vector.multi_reduction <add>, %107, %cst_48 [1, 2] : vector<1x16x16xf32> to vector<1xf32>
    %109 = vector.shape_cast %108 : vector<1xf32> to vector<1x1x1xf32>
    %110 = vector.extract %109[0, 0, 0] : f32 from vector<1x1x1xf32>
    %cst_49 = arith.constant 0.000000e+00 : f32
    %111 = arith.addf %cst_49, %110 : f32
    %112 = tpu.iota {dimensions = array<i32: 1>} : vector<1x128xi32>
    %c0_i32_50 = arith.constant 0 : i32
    %113 = vector.broadcast %c0_i32_50 : i32 to vector<1x128xi32>
    %114 = arith.cmpi eq, %112, %113 : vector<1x128xi32>
    %c1_i32_51 = arith.constant 1 : i32
    %115 = vector.broadcast %c1_i32_51 : i32 to vector<1x128xi32>
    %116 = arith.cmpi eq, %112, %115 : vector<1x128xi32>
    %c2_i32_52 = arith.constant 2 : i32
    %117 = vector.broadcast %c2_i32_52 : i32 to vector<1x128xi32>
    %118 = arith.cmpi eq, %112, %117 : vector<1x128xi32>
    %c3_i32_53 = arith.constant 3 : i32
    %119 = vector.broadcast %c3_i32_53 : i32 to vector<1x128xi32>
    %120 = arith.cmpi eq, %112, %119 : vector<1x128xi32>
    %cst_54 = arith.constant 0.000000e+00 : f32
    %121 = vector.broadcast %111 : f32 to vector<1x128xf32>
    %122 = vector.broadcast %cst_54 : f32 to vector<1x128xf32>
    %123 = arith.select %120, %121, %122 : vector<1x128xi1>, vector<1x128xf32>
    %124 = vector.broadcast %106 : f32 to vector<1x128xf32>
    %125 = arith.select %118, %124, %123 : vector<1x128xi1>, vector<1x128xf32>
    %126 = vector.broadcast %100 : f32 to vector<1x128xf32>
    %127 = arith.select %116, %126, %125 : vector<1x128xi1>, vector<1x128xf32>
    %128 = vector.broadcast %95 : f32 to vector<1x128xf32>
    %129 = arith.select %114, %128, %127 : vector<1x128xi1>, vector<1x128xf32>
    %c0_55 = arith.constant 0 : index
    %c0_56 = arith.constant 0 : index
    %c0_57 = arith.constant 0 : index
    %130 = vector.load %arg3[%c0_55, %c0_56, %c0_57] : memref<1x1x128xf32, #tpu.memory_space<vmem>>, vector<1x1x128xf32>
    %131 = vector.shape_cast %130 : vector<1x1x128xf32> to vector<1x128xf32>
    %132 = vector.shape_cast %129 : vector<1x128xf32> to vector<1x1x128xf32>
    tpu.vector_store %arg3[%c0_55, %c0_56, %c0_57], %132 {strides = array<i32>} : memref<1x1x128xf32, #tpu.memory_space<vmem>>, vector<1x1x128xf32>,
    return
  }
  func.func @transform_0(%arg0: i32) -> (i32, i32, i32, i32) {
    %c0_i32 = arith.constant 0 : i32
    %c0_i32_0 = arith.constant 0 : i32
    %c0_i32_1 = arith.constant 0 : i32
    %c0_i32_2 = arith.constant 0 : i32
    return %arg0, %c0_i32, %c0_i32_0, %c0_i32_1 : i32, i32, i32, i32
  }
  func.func @transform_1(%arg0: i32) -> (i32, i32, i32, i32) {
    %c0_i32 = arith.constant 0 : i32
    %c0_i32_0 = arith.constant 0 : i32
    %c0_i32_1 = arith.constant 0 : i32
    %c0_i32_2 = arith.constant 0 : i32
    return %arg0, %c0_i32, %c0_i32_0, %c0_i32_1 : i32, i32, i32, i32
  }
  func.func @transform_2(%arg0: i32) -> (i32, i32, i32) {
    %c0_i32 = arith.constant 0 : i32
    %c0_i32_0 = arith.constant 0 : i32
    %c0_i32_1 = arith.constant 0 : i32
    return %arg0, %c0_i32, %c0_i32_0 : i32, i32, i32
  }
}

</mosaic_0001>

<bundles_post_ra>
// kernel: tpu_custom_call.1
= control target key start
LH: loop header
LB: loop body
LE: loop exit
PB: predicated region body
PF: predicated region fallthrough
CT: control target
= control target key end

     0   :  { %7 = vsyncpa [#allocation3], 0  ;;  %s1278_s0 = inlined_call_operand.hbm [shape: f32[2,4,16,16], index: 0, kind: input, shape index: {}]   ;;  %s1279_s1 = inlined_call_operand.hbm [shape: f32[2,4,16,16], index: 1, kind: input, shape index: {}]   ;;  %s1280_s2 = inlined_call_operand.hbm [shape: f32[2,1,128], index: 2, kind: output, shape index: {}]  }
   0x1   :  { %9 = vsyncpa [#allocation3 + $0x1], 0 }
   0x2   :  { %10 = vsyncpa [#allocation6], 0 }
   0x3   :  { %12 = vsyncpa [#allocation6 + $0x1], 0 }
   0x4   :  { %13 = vsyncpa [#allocation4], 0 }
   0x5   :  { %15 = vsyncpa [#allocation4 + $0x1], 0  ;;  %s915_s9 = smov 0   ;;  %s917_s10 = smov 0  }
   0x6   :  { %s919_s11 = smov 0   ;;  %s921_s12 = smov 0  }
   0x7 LB: > { %s936_s13 = sadd.s32 4294967295, %s892_s12   ;;  %s649_s14 = sadd.s32 4294967294, %s892_s12   ;;  %s892_s12 = sphi %s921_s12, %s1291_s12   ;;  %s888_s11 = sphi %s919_s11, %s1290_s11   ;;  %s884_s10 = sphi %s917_s10, %s1289_s10   ;;  %s880_s9 = sphi %s915_s9, %s1288_s9  }
   0x8   : > { %s940_s15 = sadd.s32 1, %s892_s12   ;;  %s28_s16 = sadd.s32 1, %s888_s11 }
   0x9   : > { %s25_s17 = ssub.s32 %s892_s12, %s940_s15  ;;  %p35_p0 = scmp.ne.s32.totalorder %s888_s11, %s884_s10 }
   0xa   : > { %p26_p1 = scmp.eq.s32.totalorder %s25_s17, 0  ;;  %p36_p2 = scmp.eq.s32.totalorder %s892_s12, 0 }
   0xb   : > { %p41_p3 = scmp.ne.s32.totalorder %s884_s10, %s880_s9  ;;  %p42_p4 = scmp.eq.s32.totalorder %s936_s13, 0 }
   0xc   : > { %s952_s18 = scalar_select %p26_p1, %s888_s11, %s28_s16  }
   0xd   : > { %p954_p5 = por %p36_p2, %p35_p0  ;;  %p958_p6 = por %p42_p4, %p41_p3 }
   0xe   : > { %p91_p7 = scmp.eq.s32.totalorder %s936_s13, 1  ;;  %p97_p8 = scmp.eq.s32.totalorder %s649_s14, 1 }
   0xf   : > { %p707_p10 = scmp.lt.s32.totalorder %s892_s12, 2  ;;  %s974_s23 = sand.u32 1, %s888_s11  }
  0x10   : > { %p965_p11 = por %p91_p7, %p35_p0  ;;  %p969_p12 = por %p97_p8, %p41_p3 }
  0x11   : > { %s680_s24 = sshll.u32 %s892_s12, 6  ;;  %s652_s25 = sshll.u32 %s974_s23, 6 }
  0x12   : > { %s126_s28 = scalar_lea.hbm %s1278_s0, %s680_s24  ;;  %s121_s30 = scalar_lea.vmem [#allocation2], %s652_s25 }
  0x13   : > { %s127_s29 = sshll.u32 %s126_s28, 4  ;;  %s129_s3 = sshll.u32 %s121_s30, 4  ;;  %s128_s29 = int_to_ptr.hbm [resolvable:$true] %s127_s29  ;;  %s130_s3 = int_to_ptr.vmem [resolvable:$true] %s129_s3 }
  0x14   : > { %p987_p13 = pnand %p707_p10, %p954_p5  ;;  %p658_p0 = scmp.ge.s32.totalorder %s892_s12, 1 }
  0x15   : > { %p159_p1 = scmp.lt.s32.totalorder %s892_s12, 3  ;;  %s118_s5 = scalar_lea.sflag [#allocation3], %s974_s23 }
  0x16   : > { %s762_s6 = sshra.s32 %s128_s29, 4  ;;  %p766_p3 = pneg %p987_p13  ;;  %s763_s6 = int_to_ptr.hbm [resolvable:$true] %s762_s6 }
  0x17   : > { %s764_s7 = scalar_lea.hbm %s763_s6, 64  ;;  %s769_s16 = scalar_lea.hbm %s1278_s0, 128 }
  0x18   : > { %p765_p2 = scmp.ne.s32.totalorder %s763_s6, %s764_s7  ;;  %p770_p5 = scmp.lt.s32.totalorder %s763_s6, %s1278_s0 }
  0x19   : > { %p771_p8 = scmp.lt.s32.totalorder %s769_s16, %s764_s7 }
  0x1a   : > { %p767_p4 = pnand %p766_p3, %p765_p2 }
  0x1b   : > { %p772_p10 = por %p771_p8, %p770_p5 }
  0x1c   : > { %p768_p7 = pneg %p767_p4 }
  0x1e   : > { %p773_p9 = pnand %p772_p10, %p768_p7 }
  0x20   : > { %776 = shalt.err (!%p773_p9)
}
  0x21   : > { %s894_s26 = smov 128   ;;  %s895_s27 = smov 8  }
  0x22   : > { %699 = dma.hbm_to_vmem [thread:$0]  (!%p987_p13), %s128_s29, 1024, %s130_s3, %s118_s5, %s894_s26, %s894_s26, %s895_s27  }
  0x23   : > { %p1011_p2 = pnand %p658_p0, %p159_p1  ;;  %s148_s7 = scalar_lea.hbm %s1279_s1, %s680_s24 }
  0x24   : > { %s149_s8 = sshll.u32 %s148_s7, 4  ;;  %s143_s14 = scalar_lea.vmem [#allocation5], %s652_s25  ;;  %s150_s8 = int_to_ptr.hbm [resolvable:$true] %s149_s8 }
  0x25   : > { %s151_s16 = sshll.u32 %s143_s14, 4  ;;  %s140_s17 = scalar_lea.sflag [#allocation6], %s974_s23  ;;  %s152_s16 = int_to_ptr.vmem [resolvable:$true] %s151_s16 }
  0x26   : > { %s792_s19 = sshra.s32 %s150_s8, 4  ;;  %s799_s30 = scalar_lea.hbm %s1279_s1, 128  ;;  %s793_s19 = int_to_ptr.hbm [resolvable:$true] %s792_s19 }
  0x27   : > { %s794_s29 = scalar_lea.hbm %s793_s19, 64  ;;  %p800_p4 = scmp.lt.s32.totalorder %s793_s19, %s1279_s1 }
  0x28   : > { %p795_p9 = scmp.ne.s32.totalorder %s793_s19, %s794_s29  ;;  %p801_p7 = scmp.lt.s32.totalorder %s799_s30, %s794_s29 }
  0x2a   : > { %p797_p0 = pnand %p795_p9, %p766_p3  ;;  %p802_p5 = por %p801_p7, %p800_p4 }
  0x2c   : > { %p798_p1 = pneg %p797_p0 }
  0x2e   : > { %p803_p8 = pnand %p802_p5, %p798_p1 }
  0x30   : > { %806 = shalt.err (!%p803_p8)
}
  0x31   : > { %702 = dma.hbm_to_vmem [thread:$0]  (!%p987_p13), %s150_s8, 1024, %s152_s16, %s140_s17, %s894_s26, %s894_s26, %s895_s27  }
  0x32   : > { %163 = sbr.rel (%p1011_p2) target bundleno = 836 (0x344), region = 28  ;;  %s1037_s23 = sand.u32 (!%p1011_p2), 1, %s884_s10  }
  0x33   : > { %s659_s25 = sshll.u32 (!%p1011_p2), %s1037_s23, 6  ;;  %s166_s7 = scalar_lea.sflag (!%p1011_p2), [#allocation3], %s1037_s23 }
  0x34   : > { %s1041_s14 = scalar_lea.vmem (!%p1011_p2), [#allocation2], %s659_s25 }
  0x37   : > { %867 = dma.done.wait (%p958_p6), %s166_s7, 1024  }
  0x38   : > { %869 = vsyncadd (%p958_p6), %s166_s7, 4294966272  ;;  %s176_s4 = scalar_lea.sflag [#allocation6], %s1037_s23  ;;  %s1048_s26 = scalar_lea.vmem [#allocation5], %s659_s25 }
  0x39   : > { %871 = dma.done.wait (%p958_p6), %s176_s4, 1024  }
  0x3a   : > { %873 = vsyncadd (%p958_p6), %s176_s4, 4294966272  ;;  %v205_v0 = vlaneseq  ;;  %s896_s27 = smov 16   ;;  %v245_v2 = vld [vmem:[%s1048_s26] sm:$0xff]  ;;  %v246_v3 = vld [vmem:[%s1048_s26 + $0x8] sm:$0xff]  ;;  %v897_v4 = vmov 0.0   ;;  %vm207_vm2 = vcmask 1047680   ;;  %s556_s29 = scalar_lea.hbm %s1280_s2, %s936_s13 }
  0x3b   : > { %vm247_vm0 = vcmp.gt.f32.partialorder %v245_v2, -100.0  ;;  %vm248_vm1 = vcmp.gt.f32.partialorder %v246_v3, -100.0  ;;  %v290_v8 = vld [vmem:[%s1041_s14 + $0x8] sm:$0xff]  ;;  %v670_v10 = vld [vmem:[%s1041_s14 + $0x20] sm:$0xff]  ;;  %v675_v15 = vld [vmem:[%s1041_s14 + $0x38] sm:$0xff]  ;;  %s898_s20 = smov 1  }
  0x3c   : > { %v1055_v1 = vand.u32 127, %v205_v0  ;;  %v1062_v5 = vsel %vm247_vm0, 1.0, %v897_v4  ;;  %v1065_v6 = vsel %vm248_vm1, 1.0, %v897_v4  ;;  %v1071_v9 = vsub.f32 %v290_v8, %v246_v3  ;;  %v672_v11 = vld [vmem:[%s1048_s26 + $0x20] sm:$0xff]  ;;  %v677_v16 = vld [vmem:[%s1048_s26 + $0x38] sm:$0xff]  ;;  %v666_v23 = vld [vmem:[%s1041_s14 + $0x10] sm:$0xff] }
  0x3d   : > { %v747_v7 = vpack.i.bf16 %v1065_v6, %v1062_v5  ;;  %v1077_v12 = vsub.f32 %v670_v10, %v672_v11  ;;  %v1086_v17 = vsub.f32 %v675_v15, %v677_v16  ;;  %v668_v24 = vld [vmem:[%s1048_s26 + $0x10] sm:$0xff]  ;;  %v289_v27 = vld [vmem:[%s1041_s14] sm:$0xff]  ;;  %v671_v29 = vld [vmem:[%s1041_s14 + $0x28] sm:$0xff]  ;;  %s899_s28 = smov 127   ;;  %vm479_vm5 = vcmask 130048   ;;  %s204_s30 = scalar_lea.vmem [#allocation7], %s1037_s23 }
  0x3e   : > { %208 = vrot.lane.b32.xlu0 %v1055_v1, %s896_s27  ;;  %v1099_v26 = vsub.f32 %v666_v23, %v668_v24  ;;  %v1102_v28 = vsub.f32 %v289_v27, %v245_v2  ;;  %v673_v30 = vld [vmem:[%s1048_s26 + $0x28] sm:$0xff]  ;;  %v667_v32 = vld [vmem:[%s1041_s14 + $0x18] sm:$0xff]  ;;  %v674_v35 = vld [vmem:[%s1041_s14 + $0x30] sm:$0xff]  ;;  %vm537_vm11 = vcmp.eq.s32.totalorder %v1055_v1, 3  ;;  %vm536_vm12 = vcmp.eq.s32.totalorder %v1055_v1, 2  ;;  %s558_s24 = sshll.u32 %s204_s30, 4  ;;  %s559_s24 = int_to_ptr.vmem [resolvable:$true] %s558_s24 }
  0x3f   : > { %v1108_v31 = vsub.f32 %v671_v29, %v673_v30  ;;  %v669_v33 = vld [vmem:[%s1048_s26 + $0x18] sm:$0xff]  ;;  %v676_v36 = vld [vmem:[%s1048_s26 + $0x30] sm:$0xff]  ;;  %vm535_vm13 = vcmp.eq.s32.totalorder %v1055_v1, 1  ;;  %s560_s6 = sshll.u32 %s556_s29, 4  ;;  %vm534_vm14 = vcmp.eq.s32.totalorder %v1055_v1, 0  ;;  %s548_s13 = scalar_lea.sflag [#allocation4], %s1037_s23  ;;  %s561_s6 = int_to_ptr.hbm [resolvable:$true] %s560_s6 }
  0x40   : > { %v1116_v34 = vsub.f32 %v667_v32, %v669_v33  ;;  %v1122_v37 = vsub.f32 %v674_v35, %v676_v36  ;;  %s836_s25 = sshra.s32 %s561_s6, 4  ;;  %s842_s26 = scalar_lea.hbm %s1280_s2, 2  ;;  %s837_s25 = int_to_ptr.hbm [resolvable:$true] %s836_s25 }
  0x41   : > { %s838_s7 = scalar_lea.hbm %s837_s25, 1  ;;  %p843_p10 = scmp.lt.s32.totalorder %s837_s25, %s1280_s2 }
  0x42   : > { %p839_p6 = scmp.ne.s32.totalorder %s837_s25, %s838_s7  ;;  %p844_p2 = scmp.lt.s32.totalorder %s842_s26, %s838_s7 }
  0x44   : > { %p840_p13 = pnand %p839_p6, %p965_p11  ;;  %p845_p9 = por %p844_p2, %p843_p10 }
  0x46   : > { %748 = vrot.lane.b32.xlu0 %v747_v7, %s896_s27  ;;  %p841_p3 = pneg %p840_p13 }
  0x48   : > { %p846_p0 = pnand %p845_p9, %p841_p3 }
  0x4e   : > { %296 = vrot.lane.b32.xlu0 %v1071_v9, %s896_s27 }
  0x56   : > { %381 = vrot.lane.b32.xlu0 %v1077_v12, %s896_s27 }
  0x5e   : > { %428 = vrot.lane.b32.xlu0 %v1086_v17, %s896_s27 }
  0xb0   : > { %v209_v13 = vpop.permute.xlu0 %208 }
  0xb1   : > { %v210_v14 = vsel %vm207_vm2, %v209_v13, %v1055_v1 }
  0xb2   : > { %211 = vrot.lane.b32.xlu1 %v210_v14, %s896_s27 }
  0xb8   : > { %v749_v18 = vpop.permute.xlu0 %748 }
  0xb9   : > { %v751_v19 = vunpack.i.h.bf16 %v749_v18  ;;  %v750_v20 = vunpack.i.l.bf16 %v749_v18 }
  0xba   : > { %214 = vrot.lane.b32.xlu1 %v1055_v1, %s898_s20 }
  0xbb   : > { %v255_v21 = vsel %vm207_vm2, %v750_v20, %v1062_v5  ;;  %v258_v22 = vsel %vm207_vm2, %v751_v19, %v1065_v6 }
  0xbc   : > { %v752_v25 = vpack.i.bf16 %v258_v22, %v255_v21 }
  0xbe   : > { %753 = vrot.lane.b32.xlu2 %v752_v25, %s896_s27 }
  0xc0   : > { %v297_v45 = vpop.permute.xlu0 %296 }
  0xc1   : > { %v298_v47 = vsel %vm207_vm2, %v297_v45, %v1071_v9 }
  0xc2   : > { %337 = vrot.lane.b32.xlu1 %v1099_v26, %s896_s27 }
  0xc6   : > { %293 = vrot.lane.b32.xlu2 %v1102_v28, %s896_s27 }
  0xc8   : > { %v382_v58 = vpop.permute.xlu0 %381 }
  0xc9   : > { %v383_v7 = vsel %vm207_vm2, %v382_v58, %v1077_v12 }
  0xca   : > { %384 = vrot.lane.b32.xlu1 %v1108_v31, %s896_s27 }
  0xce   : > { %340 = vrot.lane.b32.xlu2 %v1116_v34, %s896_s27 }
  0xd0   : > { %v429_v63 = vpop.permute.xlu0 %428 }
  0xd1   : > { %v430_v3 = vsel %vm207_vm2, %v429_v63, %v1086_v17 }
  0xd6   : > { %425 = vrot.lane.b32.xlu2 %v1122_v37, %s896_s27 }
 0x118   : > { %v754_v38 = vpop.permute.xlu2 %753 }
 0x119   : > { %v756_v39 = vunpack.i.h.bf16 %v754_v38  ;;  %v755_v40 = vunpack.i.l.bf16 %v754_v38 }
 0x11b   : > { %v263_v41 = vsel %vm207_vm2, %v755_v40, %v1062_v5  ;;  %v264_v42 = vsel %vm207_vm2, %v756_v39, %v1065_v6 }
 0x11c   : > { %v757_v43 = vpack.i.bf16 %v264_v42, %v263_v41 }
 0x11e   : > { %758 = vrot.lane.b32.xlu1 %v757_v43, %s899_s28 }
 0x120   : > { %v294_v44 = vpop.permute.xlu2 %293 }
 0x121   : > { %v295_v46 = vsel %vm207_vm2, %v294_v44, %v1102_v28 }
 0x122   : > { %299 = vrot.lane.b32.xlu0 %v295_v46, %s896_s27 }
 0x124   : > { %v212_v48 = vpop.permute.xlu1 %211 }
 0x125   : > { %v213_v51 = vsel %vm207_vm2, %v212_v48, %v1055_v1 }
 0x126   : > { %301 = vrot.lane.b32.xlu1 %v298_v47, %s896_s27 }
 0x128   : > { %v341_v49 = vpop.permute.xlu2 %340 }
 0x129   : > { %v342_v50 = vsel %vm207_vm2, %v341_v49, %v1116_v34 }
 0x12a   : > { %345 = vrot.lane.b32.xlu0 %v342_v50, %s896_s27 }
 0x12c   : > { %v215_v52 = vpop.permute.xlu1 %214 }
 0x12d   : > { %v216_v53 = vsub.s32 %v213_v51, %v215_v52 }
 0x12e   : > { %307 = vrot.lane.b32.xlu1 %v1102_v28, %s898_s20 }
 0x12f   : > { %vm217_vm3 = vcmp.lt.s32.totalorder %v216_v53, 0  ;;  %v218_v54 = vsub.s32 0, %v216_v53 }
 0x130   : > { %v426_v62 = vpop.permute.xlu2 %425 }
 0x131   : > { %v219_v55 = vsel %vm217_vm3, %v218_v54, %v216_v53  ;;  %v427_v2 = vsel %vm207_vm2, %v426_v62, %v1122_v37 }
 0x132   : > { %vm220_vm4 = vcmp.eq.s32.totalorder %v219_v55, 1  ;;  %351 = vrot.lane.b32.xlu0 %v1099_v26, %s898_s20 }
 0x133   : > { %v661_v56 = vsel %vm220_vm4, 1.0, %v897_v4 }
 0x134   : > { %276 = vrot.lane.b32.xlu2 %v661_v56, %s899_s28  ;;  %v338_v57 = vpop.permute.xlu1 %337 }
 0x135   : > { %v339_v59 = vsel %vm207_vm2, %v338_v57, %v1099_v26 }
 0x136   : > { %353 = vrot.lane.b32.xlu1 %v1116_v34, %s898_s20 }
 0x13c   : > { %v385_v60 = vpop.permute.xlu1 %384  ;;  %343 = vrot.lane.b32.xlu2 %v339_v59, %s896_s27 }
 0x13d   : > { %v386_v61 = vsel %vm207_vm2, %v385_v60, %v1108_v31 }
 0x13e   : > { %389 = vrot.lane.b32.xlu0 %v386_v61, %s896_s27  ;;  %395 = vrot.lane.b32.xlu1 %v1077_v12, %s898_s20 }
 0x144   : > { %309 = vrot.lane.b32.xlu2 %v1071_v9, %s898_s20 }
 0x146   : > { %431 = vrot.lane.b32.xlu0 %v427_v2, %s896_s27  ;;  %433 = vrot.lane.b32.xlu1 %v430_v3, %s896_s27 }
 0x14c   : > { %387 = vrot.lane.b32.xlu2 %v383_v7, %s896_s27 }
 0x14e   : > { %441 = vrot.lane.b32.xlu0 %v1086_v17, %s898_s20 }
 0x154   : > { %397 = vrot.lane.b32.xlu2 %v1108_v31, %s898_s20 }
 0x15c   : > { %439 = vrot.lane.b32.xlu2 %v1122_v37, %s898_s20 }
 0x18e   : > { %v277_v15 = vpop.permute.xlu2 %276 }
 0x190   : > { %v759_v8 = vpop.permute.xlu1 %758 }
 0x191   : > { %v761_v10 = vunpack.i.h.bf16 %v759_v8  ;;  %v760_v11 = vunpack.i.l.bf16 %v759_v8 }
 0x193   : > { %v274_v13 = vmul.f32 %v761_v10, %v1065_v6  ;;  %v273_v14 = vmul.f32 %v760_v11, %v1062_v5 }
 0x194   : > { %v300_v22 = vpop.permute.xlu0 %299 }
 0x195   : > { %v280_v16 = vmul.f32 %v277_v15, %v274_v13  ;;  %v279_v18 = vmul.f32 %v277_v15, %v273_v14  ;;  %v303_v60 = vsel %vm207_vm2, %v300_v22, %v1102_v28  ;;  %v224_v22 = vshrl.u32 %v205_v0, 7 }
 0x196   : > { %v344_v25 = vpop.permute.xlu2 %343 }
 0x197   : > { %465 = vrot.lane.b32.xlu2 %v280_v16, %s898_s20  ;;  %463 = vrot.lane.b32.xlu1 %v279_v18, %s898_s20  ;;  %v493_v19 = vsel %vm479_vm5, %v279_v18, 0.0  ;;  %v494_v20 = vsel %vm479_vm5, %v280_v16, 0.0  ;;  %v347_v61 = vsel %vm207_vm2, %v344_v25, %v1099_v26  ;;  %v316_v25 = vrot.slane %v1071_v9, 1 }
 0x198   : > { %v495_v21 = vadd.f32 %v494_v20, %v493_v19  ;;  %v302_v23 = vpop.permute.xlu1 %301  ;;  %vm228_vm6 = vcmp.lt.s32.totalorder %v224_v22, 7 }
 0x199   : > { %v304_v38 = vsel %vm207_vm2, %v302_v23, %v1071_v9  ;;  %v225_v23 = vadd.s32 8, %v224_v22 }
 0x19c   : > { %v346_v24 = vpop.permute.xlu0 %345 }
 0x19d   : > { %v348_v39 = vsel %vm207_vm2, %v346_v24, %v1116_v34  ;;  %v315_v24 = vrot.slane %v1102_v28, 1 }
 0x19e   : > { %v310_v30 = vpop.permute.xlu2 %309 }
 0x19f   : > { %v314_v42 = vsub.f32 %v304_v38, %v310_v30  ;;  %v226_v30 = vrot.slane %v224_v22, 1 }
 0x1a0   : > { %v308_v27 = vpop.permute.xlu1 %307 }
 0x1a1   : > { %v322_v46 = vmul.f32 %v314_v42, %v314_v42  ;;  %v313_v62 = vsub.f32 %v303_v60, %v308_v27  ;;  %v359_v27 = vrot.slane %v1099_v26, 1 }
 0x1a3   : > { %v321_v3 = vmul.f32 %v313_v62, %v313_v62  ;;  %v448_v62 = vrot.slane %v1086_v17, 1 }
 0x1a4   : > { %v352_v29 = vpop.permute.xlu0 %351 }
 0x1a5   : > { %v357_v63 = vsub.f32 %v347_v61, %v352_v29  ;;  %v360_v29 = vrot.slane %v1116_v34, 1  ;;  %v447_v61 = vrot.slane %v1122_v37, 1 }
 0x1a6   : > { %v388_v35 = vpop.permute.xlu2 %387 }
 0x1a7   : > { %v391_v2 = vsel %vm207_vm2, %v388_v35, %v1077_v12  ;;  %v365_v7 = vmul.f32 %v357_v63, %v357_v63  ;;  %v318_v35 = vsel %vm228_vm6, %v316_v25, %v315_v24  ;;  %v362_v0 = vsel %vm228_vm6, %v360_v29, %v359_v27 }
 0x1a8   : > { %v354_v32 = vpop.permute.xlu1 %353 }
 0x1a9   : > { %v358_v43 = vsub.f32 %v348_v39, %v354_v32  ;;  %v367_v11 = vadd.f32 %v365_v7, %v321_v3  ;;  %v227_v32 = vrot.slane %v225_v23, 1 }
 0x1ab   : > { %v366_v47 = vmul.f32 %v358_v43, %v358_v43  ;;  %v230_v38 = vsel %vm228_vm6, %v227_v32, %v226_v30 }
 0x1ac   : > { %v232_v42 = vsub.s32 %v230_v38, %v225_v23 }
 0x1ad   : > { %v368_v51 = vadd.f32 %v366_v47, %v322_v46  ;;  %v403_v47 = vrot.slane %v1077_v12, 1 }
 0x1ae   : > { %v398_v41 = vpop.permute.xlu2 %397  ;;  %vm236_vm8 = vcmp.lt.s32.totalorder %v232_v42, 0 }
 0x1b0   : > { %v390_v33 = vpop.permute.xlu0 %389  ;;  %v396_v36 = vpop.permute.xlu1 %395 }
 0x1b1   : > { %v392_v44 = vsel %vm207_vm2, %v390_v33, %v1108_v31  ;;  %v401_v8 = vsub.f32 %v391_v2, %v396_v36  ;;  %v317_v33 = vsel %vm228_vm6, %v315_v24, %v316_v25  ;;  %v229_v36 = vsel %vm228_vm6, %v226_v30, %v227_v32 }
 0x1b2   : > { %v402_v48 = vsub.f32 %v392_v44, %v398_v41  ;;  %v319_v39 = vsub.f32 %v317_v33, %v1102_v28  ;;  %v231_v41 = vsub.s32 %v229_v36, %v224_v22  ;;  %v364_v44 = vsub.f32 %v362_v0, %v1116_v34 }
 0x1b3   : > { %v409_v13 = vmul.f32 %v401_v8, %v401_v8  ;;  %v282_v28 = vrot.slane %v1065_v6, 1 }
 0x1b4   : > { %v410_v52 = vmul.f32 %v402_v48, %v402_v48  ;;  %v404_v48 = vrot.slane %v1108_v31, 1  ;;  %vm233_vm7 = vcmp.lt.s32.totalorder %v231_v41, 0 }
 0x1b5   : > { %v411_v15 = vadd.f32 %v409_v13, %v367_v11  ;;  %v449_v11 = vsel %vm228_vm6, %v447_v61, %v448_v62 }
 0x1b6   : > { %v440_v54 = vpop.permute.xlu2 %439  ;;  %v412_v55 = vadd.f32 %v410_v52, %v368_v51  ;;  %v281_v51 = vrot.slane %v1062_v5, 1  ;;  %v370_v52 = vmul.f32 %v364_v44, %v364_v44 }
 0x1b8   : > { %v432_v40 = vpop.permute.xlu0 %431  ;;  %v434_v45 = vpop.permute.xlu1 %433  ;;  %v283_v34 = vsel %vm228_vm6, %v281_v51, %v282_v28 }
 0x1b9   : > { %v436_v50 = vsel %vm207_vm2, %v434_v45, %v1086_v17  ;;  %v435_v10 = vsel %vm207_vm2, %v432_v40, %v1122_v37  ;;  %v320_v40 = vsub.f32 %v318_v35, %v1071_v9  ;;  %v325_v45 = vmul.f32 %v319_v39, %v319_v39 }
 0x1ba   : > { %v445_v14 = vsub.f32 %v435_v10, %v440_v54  ;;  %v284_v54 = vsel %vm228_vm6, %v282_v28, %v281_v51  ;;  %v285_v3 = vmul.f32 %v1062_v5, %v283_v34 }
 0x1bb   : > { %v326_v46 = vmul.f32 %v320_v40, %v320_v40  ;;  %v286_v7 = vmul.f32 %v1065_v6, %v284_v54 }
 0x1bc   : > { %v453_v16 = vmul.f32 %v445_v14, %v445_v14 }
 0x1be   : > { %v455_v18 = vadd.f32 %v453_v16, %v411_v15 }
 0x1c0   : > { %v442_v49 = vpop.permute.xlu0 %441 }
 0x1c1   : > { %v446_v53 = vsub.f32 %v436_v50, %v442_v49  ;;  %v234_v49 = vsub.s32 0, %v231_v41  ;;  %v237_v50 = vsub.s32 0, %v232_v42 }
 0x1c3   : > { %v454_v56 = vmul.f32 %v446_v53, %v446_v53  ;;  %v235_v53 = vsel %vm233_vm7, %v234_v49, %v231_v41 }
 0x1c4   : > { %vm239_vm9 = vcmp.eq.s32.totalorder %v235_v53, 1 }
 0x1c5   : > { %v456_v57 = vadd.f32 %v454_v56, %v412_v55  ;;  %v372_v56 = vadd.f32 %v370_v52, %v326_v46  ;;  %v662_v63 = vsel %vm239_vm9, 1.0, %v897_v4 }
 0x1c6   : > { %v287_v16 = vmul.f32 %v662_v63, %v285_v3 }
 0x1c8   : > { %v521_v32 = vsel %vm479_vm5, %v287_v16, 0.0 }
 0x1f1   : > { %v466_v58 = vpop.permute.xlu2 %465 }
 0x1f2   : > { %v470_v59 = vmul.f32 %v466_v58, %v456_v57  ;;  %v405_v57 = vsel %vm228_vm6, %v403_v47, %v404_v48  ;;  %v406_v58 = vsel %vm228_vm6, %v404_v48, %v403_v47 }
 0x1f3   : > { %v408_v60 = vsub.f32 %v406_v58, %v1108_v31  ;;  %v451_v31 = vsub.f32 %v449_v11, %v1122_v37 }
 0x1f4   : > { %475 = vrot.lane.b32.xlu1 %v470_v59, %s899_s28  ;;  %v407_v59 = vsub.f32 %v405_v57, %v1077_v12  ;;  %v450_v12 = vsel %vm228_vm6, %v448_v62, %v447_v61 }
 0x1f5   : > { %v414_v10 = vmul.f32 %v408_v60, %v408_v60  ;;  %v452_v13 = vsub.f32 %v450_v12, %v1086_v17 }
 0x1f6   : > { %v413_v8 = vmul.f32 %v407_v59, %v407_v59 }
 0x1f7   : > { %v416_v15 = vadd.f32 %v414_v10, %v372_v56 }
 0x209   : > { %v464_v19 = vpop.permute.xlu1 %463 }
 0x20a   : > { %v469_v20 = vmul.f32 %v464_v19, %v455_v18  ;;  %v457_v19 = vmul.f32 %v451_v31, %v451_v31 }
 0x20c   : > { %473 = vrot.lane.b32.xlu0 %v469_v20, %s899_s28 }
 0x236   : > { %496 = vadd.xlane.f32.xlu0 %v495_v21  ;;  %v361_v21 = vsel %vm228_vm6, %v359_v27, %v360_v29 }
 0x237   : > { %v363_v43 = vsub.f32 %v361_v21, %v1099_v26  ;;  %v238_v26 = vsel %vm236_vm8, %v237_v50, %v232_v42 }
 0x238   : > { %vm240_vm10 = vcmp.eq.s32.totalorder %v238_v26, 1 }
 0x239   : > { %v369_v9 = vmul.f32 %v363_v43, %v363_v43  ;;  %v663_v2 = vsel %vm240_vm10, 1.0, %v897_v4  ;;  %v458_v4 = vmul.f32 %v452_v13, %v452_v13 }
 0x23a   : > { %v288_v18 = vmul.f32 %v663_v2, %v286_v7 }
 0x23b   : > { %v371_v55 = vadd.f32 %v369_v9, %v325_v45  ;;  %v460_v5 = vadd.f32 %v458_v4, %v416_v15 }
 0x23c   : > { %v522_v33 = vsel %vm479_vm5, %v288_v18, 0.0 }
 0x23d   : > { %v415_v14 = vadd.f32 %v413_v8, %v371_v55  ;;  %v507_v6 = vmul.f32 %v460_v5, %v288_v18  ;;  %v523_v35 = vadd.f32 %v522_v33, %v521_v32 }
 0x23f   : > { %v459_v20 = vadd.f32 %v457_v19, %v415_v14  ;;  %v509_v25 = vsel %vm479_vm5, %v507_v6, 0.0 }
 0x241   : > { %v506_v23 = vmul.f32 %v459_v20, %v287_v16 }
 0x243   : > { %v508_v24 = vsel %vm479_vm5, %v506_v23, 0.0 }
 0x244   : > { %v510_v22 = vadd.f32 %v509_v25, %v508_v24 }
 0x246   : > { %511 = vadd.xlane.f32.xlu1 %v510_v22 }
 0x266   : > { %v476_v27 = vpop.permute.xlu1 %475 }
 0x267   : > { %v481_v17 = vsel %vm479_vm5, %v476_v27, 0.0 }
 0x27e   : > { %v474_v37 = vpop.permute.xlu0 %473 }
 0x27f   : > { %v480_v29 = vsel %vm479_vm5, %v474_v37, 0.0 }
 0x280   : > { %v482_v30 = vadd.f32 %v481_v17, %v480_v29 }
 0x282   : > { %483 = vadd.xlane.f32.xlu2 %v482_v30 }
 0x28a   : > { %524 = vadd.xlane.f32.xlu2 %v523_v35 }
 0x2a9   : > { %v497_v0 = vpop.xlane.xlu0 %496 }
 0x2aa   : > { %v498_v38 = vrot.slane %v497_v0, 4 }
 0x2ac   : > { %v499_v40 = vadd.f32 %v498_v38, %v497_v0 }
 0x2ae   : > { %v500_v42 = vrot.slane %v499_v40, 2 }
 0x2b0   : > { %v501_v47 = vadd.f32 %v500_v42, %v499_v40 }
 0x2b2   : > { %v502_v28 = vrot.slane %v501_v47, 1 }
 0x2b4   : > { %v503_v54 = vadd.f32 %v502_v28, %v501_v47 }
 0x2b9   : > { %v512_v21 = vpop.xlane.xlu1 %511 }
 0x2ba   : > { %v513_v36 = vrot.slane %v512_v21, 4 }
 0x2bc   : > { %v514_v39 = vadd.f32 %v513_v36, %v512_v21 }
 0x2be   : > { %v515_v41 = vrot.slane %v514_v39, 2 }
 0x2c0   : > { %v516_v46 = vadd.f32 %v515_v41, %v514_v39 }
 0x2c2   : > { %v517_v50 = vrot.slane %v516_v46, 1 }
 0x2c4   : > { %v518_v34 = vadd.f32 %v517_v50, %v516_v46 }
 0x2f5   : > { %v484_v43 = vpop.xlane.xlu2 %483 }
 0x2f6   : > { %v485_v44 = vrot.slane %v484_v43, 4 }
 0x2f8   : > { %v486_v45 = vadd.f32 %v485_v44, %v484_v43 }
 0x2fa   : > { %v487_v48 = vrot.slane %v486_v45, 2 }
 0x2fc   : > { %v488_v49 = vadd.f32 %v487_v48, %v486_v45 }
 0x2fd   : > { %v525_v51 = vpop.xlane.xlu2 %524 }
 0x2fe   : > { %v526_v9 = vrot.slane %v525_v51, 4  ;;  %v489_v52 = vrot.slane %v488_v49, 1 }
 0x300   : > { %v527_v53 = vadd.f32 %v526_v9, %v525_v51  ;;  %v490_v26 = vadd.f32 %v489_v52, %v488_v49 }
 0x302   : > { %v528_v55 = vrot.slane %v527_v53, 2  ;;  %682 = vpush %v490_v26 }
 0x303   : > { %684 = vpush %v503_v54 }
 0x304   : > { %v529_v56 = vadd.f32 %v528_v55, %v527_v53  ;;  %686 = vpush %v518_v34 }
 0x306   : > { %v530_v57 = vrot.slane %v529_v56, 1 }
 0x308   : > { %v531_v58 = vadd.f32 %v530_v57, %v529_v56 }
 0x30a   : > { %688 = vpush %v531_v58 }
 0x333   : > { %s683_s8 = spop %682 }
 0x334   : > { %s685_s16 = spop %684  ;;  %v544_v2 = vstv %s683_s8 }
 0x335   : > { %s687_s3 = spop %686  ;;  %v542_v62 = vstv %s685_s16 }
 0x336   : > { %v540_v60 = vstv %s687_s3 }
 0x33b   : > { %s689_s5 = spop %688 }
 0x33c   : > { %v538_v59 = vstv %s689_s5 }
 0x33d   : > { %v539_v61 = vsel %vm537_vm11, %v538_v59, 0.0 }
 0x33e   : > { %v541_v63 = vsel %vm536_vm12, %v540_v60, %v539_v61 }
 0x33f   : > { %v543_v3 = vsel %vm535_vm13, %v542_v62, %v541_v63 }
 0x340   : > { %v545_v7 = vsel %vm534_vm14, %v544_v2, %v543_v3 }
 0x341   : > { %546 = vst [vmem:[%s204_s30] sm:$0x1] %v545_v7 }
 0x342   : > { %849 = shalt.err (!%p846_p0)
}
 0x343   : > { %694 = dma.vmem_to_hbm [thread:$0]  (%p965_p11), %s559_s24, 16, %s561_s6, %s548_s13  }
 0x344 PF: > { %s572_s23 = sand.u32 1, %s880_s9   ;;  %p1287_p1 = scmp.ge.s32.totalorder %s892_s12, 2 }
 0x345   : > { %s573_s28 = scalar_lea.sflag [#allocation4], %s572_s23 }
 0x346   : > { %p704_p4 = pnand %p1287_p1, %p969_p12 }
 0x348   : > { %p705_p7 = pneg %p704_p4 }
 0x34a   : > { %875 = dma.done.wait (%p705_p7), %s573_s28, 16  }
 0x34b   : > { %877 = vsyncadd (%p705_p7), %s573_s28, 4294967280  ;;  %p18_p5 = scmp.ge.s32.totalorder %s940_s15, 4   ;;  %s1288_s9 = smov %s884_s10 }
 0x34c   : > { %s1289_s10 = smov %s888_s11  ;;  %s1290_s11 = smov %s952_s18 }
 0x34d   : > { %s1291_s12 = smov %s940_s15  ;;  %20 = sbr.rel (!%p18_p5) target bundleno = 7 (0x7), region = 92 }
 0x352   :  { %578 = vsyncpa [#allocation3], 1 }
 0x353   :  { %580 = vsyncpa [#allocation3 + $0x1], 1 }
 0x354   :  { %581 = vsyncpa [#allocation6], 1 }
 0x355   :  { %583 = vsyncpa [#allocation6 + $0x1], 1 }
 0x356   :  { %584 = vsyncpa [#allocation4], 1 }
 0x357   :  { %586 = vsyncpa [#allocation4 + $0x1], 1 }

</bundles_post_ra>
